<compile_context>
chip_gen: v7x
topology: tpu7x:2x2x1
jax: 0.10.0
libtpu: 0.0.40
codegen_flags: <defaults>
</compile_context>

<pallas_src>
import math
import functools

import jax
import jax.numpy as jnp
from jax.experimental import pallas as pl
from jax.experimental.pallas import tpu as pltpu


def _round_up(x, m):
    return ((x + m - 1) // m) * m


# ---------------------------------------------------------------------------
# Kernels
# ---------------------------------------------------------------------------
def _matmul_kernel(a_ref, b_ref, o_ref, acc_ref):
    """acc += A_blk @ B_blk over the K grid axis; store at the last K step."""
    @pl.when(pl.program_id(2) == 0)
    def _():
        acc_ref[...] = jnp.zeros_like(acc_ref)

    acc_ref[...] += jnp.dot(
        a_ref[...], b_ref[...], preferred_element_type=jnp.float32
    )

    @pl.when(pl.program_id(2) == pl.num_programs(2) - 1)
    def _():
        o_ref[...] = acc_ref[...].astype(o_ref.dtype)


def _matmul_bias_kernel(a_ref, b_ref, bias_ref, o_ref, acc_ref):
    """Same as _matmul_kernel but adds bias (broadcast over rows) at finalize."""
    @pl.when(pl.program_id(2) == 0)
    def _():
        acc_ref[...] = jnp.zeros_like(acc_ref)

    acc_ref[...] += jnp.dot(
        a_ref[...], b_ref[...], preferred_element_type=jnp.float32
    )

    @pl.when(pl.program_id(2) == pl.num_programs(2) - 1)
    def _():
        # Bias add hoisted out of the reduction loop: only on the last K step.
        o_ref[...] = (acc_ref[...] + bias_ref[...]).astype(o_ref.dtype)


# ---------------------------------------------------------------------------
# Tiled matmul wrapper (shared by both passes)
# ---------------------------------------------------------------------------
def _tiled_matmul(a, b, *, tm, tn, tk, out_dtype, bias=None):
    """C = A @ B (+ bias), with A:[M,K], B:[K,N], bias:[1,N]; dims pre-padded."""
    M, K = a.shape
    K2, N = b.shape
    assert K == K2 and M % tm == 0 and N % tn == 0 and K % tk == 0

    grid = (M // tm, N // tn, K // tk)

    flops = 2 * M * K * N
    bytes_accessed = (
        a.size * a.dtype.itemsize
        + b.size * b.dtype.itemsize
        + M * N * jnp.dtype(out_dtype).itemsize
        + (bias.size * bias.dtype.itemsize if bias is not None else 0)
    )
    cost = pl.CostEstimate(
        flops=flops, transcendentals=0, bytes_accessed=bytes_accessed
    )

    in_specs = [
        pl.BlockSpec((tm, tk), lambda i, j, k: (i, k)),  # A row/K blocks
        pl.BlockSpec((tk, tn), lambda i, j, k: (k, j)),  # B K/col blocks
    ]
    operands = [a, b]
    if bias is not None:
        in_specs.append(pl.BlockSpec((1, tn), lambda i, j, k: (0, j)))
        operands.append(bias)
        kernel = _matmul_bias_kernel
    else:
        kernel = _matmul_kernel

    return pl.pallas_call(
        kernel,
        out_shape=jax.ShapeDtypeStruct((M, N), out_dtype),
        grid_spec=pltpu.PrefetchScalarGridSpec(
            num_scalar_prefetch=0,
            grid=grid,
            in_specs=in_specs,
            out_specs=pl.BlockSpec((tm, tn), lambda i, j, k: (i, j)),
            scratch_shapes=[pltpu.VMEM((tm, tn), jnp.float32)],
        ),
        compiler_params=pltpu.CompilerParams(
            dimension_semantics=("parallel", "parallel", "arbitrary"),
        ),
        cost_estimate=cost,
    )(*operands)


# ---------------------------------------------------------------------------
# GCN layer forward
# ---------------------------------------------------------------------------
@functools.partial(
    jax.jit, static_argnames=("tile_nodes", "tile_feat_in", "tile_feat_out")
)
def graph_convolution(
    x,
    adj,
    weight,
    bias=None,
    *,
    tile_nodes=256,
    tile_feat_in=256,
    tile_feat_out=256,
):
    """Pallas GCN layer: adj @ (x @ weight) + bias.

    x      : [N, in_features]   node features
    adj    : [N, N]             dense (row-normalized) adjacency
    weight : [in_features, out_features]
    bias   : [out_features] or None
    """
    N, in_f = x.shape
    out_f = weight.shape[1]
    out_dtype = x.dtype
    compute_dtype = jnp.bfloat16  # bf16 streaming, f32 MXU accumulation

    # Pad to lane/sublane-dense, tile-divisible shapes (sliced off at the end).
    n_p = _round_up(N, tile_nodes)
    k_p = _round_up(in_f, tile_feat_in)
    f_p = _round_up(out_f, tile_feat_out)

    x_p = jnp.pad(x, ((0, n_p - N), (0, k_p - in_f))).astype(compute_dtype)
    w_p = jnp.pad(weight, ((0, k_p - in_f), (0, f_p - out_f))).astype(compute_dtype)
    adj_p = jnp.pad(adj, ((0, n_p - N), (0, n_p - N))).astype(compute_dtype)

    # Pass 1: support = X @ W   (computed once; kept bf16 for cheap streaming)
    support = _tiled_matmul(
        x_p, w_p,
        tm=tile_nodes, tn=tile_feat_out, tk=tile_feat_in,
        out_dtype=compute_dtype,
    )

    # Pass 2: out = adj @ support (+ bias), accumulate f32, emit input dtype.
    if bias is not None:
        bias_p = jnp.pad(
            bias.reshape(1, out_f).astype(jnp.float32), ((0, 0), (0, f_p - out_f))
        )
    else:
        bias_p = None

    out = _tiled_matmul(
        adj_p, support,
        tm=tile_nodes, tn=tile_feat_out, tk=tile_nodes,
        out_dtype=out_dtype,
        bias=bias_p,
    )

    return out[:N, :out_f]


# ---------------------------------------------------------------------------
# Test
# ---------------------------------------------------------------------------
if __name__ == "__main__":
    # Small synthetic problem: N nodes, in_features -> out_features.
    N, in_features, out_features = 16, 32, 64

    key = jax.random.PRNGKey(0)
    k_x, k_adj, k_w, k_b = jax.random.split(key, 4)

    # Deterministic parameter init mimicking reset_parameters():
    # uniform(-stdv, stdv) with stdv = 1/sqrt(out_features).
    stdv = 1.0 / math.sqrt(out_features)
    weight = jax.random.uniform(
        k_w, (in_features, out_features), jnp.float32, minval=-stdv, maxval=stdv
    )
    bias = jax.random.uniform(
        k_b, (out_features,), jnp.float32, minval=-stdv, maxval=stdv
    )

    # Inputs: node features and a (dense) row-normalized adjacency matrix.
    x = jax.random.normal(k_x, (N, in_features), jnp.float32)
    adj_raw = jax.random.uniform(k_adj, (N, N), jnp.float32)
    adj = (adj_raw > 0.7).astype(jnp.float32) + jnp.eye(N, dtype=jnp.float32)
    adj = adj / jnp.sum(adj, axis=1, keepdims=True)  # row-normalize

    out = graph_convolution(x, adj, weight, bias)
    out = jax.block_until_ready(out)

    # Reference (plain JAX, f32) of the exact forward semantics.
    ref = adj @ (x @ weight) + bias
    assert out.shape == (N, out_features)
    # bf16 streaming (f32 accumulation) -> relaxed tolerance, per review.
    assert jnp.allclose(out, ref, atol=3e-2, rtol=3e-2), (
        float(jnp.max(jnp.abs(out - ref)))
    )

    print("KERNEL_OK")
</pallas_src>

<mosaic_0001>
module attributes {stable_mosaic.version = 11 : i64} {
  func.func @_matmul_kernel(%arg0: i32, %arg1: i32, %arg2: i32, %arg3: memref<256x256xbf16, #tpu.memory_space<vmem>>, %arg4: memref<256x256xbf16, #tpu.memory_space<vmem>>, %arg5: memref<256x256xbf16, #tpu.memory_space<vmem>>, %arg6: memref<256x256xf32, #tpu.memory_space<vmem>>) attributes {dimension_semantics = [#tpu.dimension_semantics<parallel>, #tpu.dimension_semantics<parallel>, #tpu.dimension_semantics<arbitrary>], iteration_bounds = array<i64: 1, 1, 1>, scalar_prefetch = 0 : i64, scratch_operands = 1 : i64, tpu.core_type = #tpu.core_type<tc>, window_params = [{transform_indices = @transform_0, window_bounds = array<i64: 256, 256>}, {transform_indices = @transform_1, window_bounds = array<i64: 256, 256>}, {transform_indices = @transform_2, window_bounds = array<i64: 256, 256>}]} {
    %c0_i32 = arith.constant 0 : i32
    %0 = arith.cmpi eq, %arg2, %c0_i32 : i32
    %1 = arith.extui %0 : i1 to i32
    %c0_i32_0 = arith.constant 0 : i32
    %2 = arith.cmpi ne, %1, %c0_i32_0 : i32
    scf.if %2 {
      %cst_10 = arith.constant 0.000000e+00 : f32
      %12 = vector.broadcast %cst_10 : f32 to vector<256x256xf32>
      %c0_11 = arith.constant 0 : index
      %c0_12 = arith.constant 0 : index
      %13 = vector.load %arg6[%c0_11, %c0_12] : memref<256x256xf32, #tpu.memory_space<vmem>>, vector<256x256xf32>
      tpu.vector_store %arg6[%c0_11, %c0_12], %12 {strides = array<i32>} : memref<256x256xf32, #tpu.memory_space<vmem>>, vector<256x256xf32>,
    } else {
    }
    %c0 = arith.constant 0 : index
    %c0_1 = arith.constant 0 : index
    %3 = vector.load %arg6[%c0, %c0_1] : memref<256x256xf32, #tpu.memory_space<vmem>>, vector<256x256xf32>
    %c0_2 = arith.constant 0 : index
    %c0_3 = arith.constant 0 : index
    %4 = vector.load %arg3[%c0_2, %c0_3] : memref<256x256xbf16, #tpu.memory_space<vmem>>, vector<256x256xbf16>
    %c0_4 = arith.constant 0 : index
    %c0_5 = arith.constant 0 : index
    %5 = vector.load %arg4[%c0_4, %c0_5] : memref<256x256xbf16, #tpu.memory_space<vmem>>, vector<256x256xbf16>
    %cst = arith.constant dense<0.000000e+00> : vector<256x256xf32>
    %6 = tpu.matmul %4, %5, %cst {dimension_numbers = #tpu.dot_dimension_numbers<[1], [0], [0], [1], [0, 0, 1, 1], [], []>} : vector<256x256xbf16>, vector<256x256xbf16>, vector<256x256xf32> -> vector<256x256xf32>
    %7 = arith.addf %3, %6 : vector<256x256xf32>
    %c0_6 = arith.constant 0 : index
    %c0_7 = arith.constant 0 : index
    %8 = vector.load %arg6[%c0_6, %c0_7] : memref<256x256xf32, #tpu.memory_space<vmem>>, vector<256x256xf32>
    tpu.vector_store %arg6[%c0_6, %c0_7], %7 {strides = array<i32>} : memref<256x256xf32, #tpu.memory_space<vmem>>, vector<256x256xf32>,
    %c0_i32_8 = arith.constant 0 : i32
    %9 = arith.cmpi eq, %arg2, %c0_i32_8 : i32
    %10 = arith.extui %9 : i1 to i32
    %c0_i32_9 = arith.constant 0 : i32
    %11 = arith.cmpi ne, %10, %c0_i32_9 : i32
    scf.if %11 {
      %c0_10 = arith.constant 0 : index
      %c0_11 = arith.constant 0 : index
      %12 = vector.load %arg6[%c0_10, %c0_11] : memref<256x256xf32, #tpu.memory_space<vmem>>, vector<256x256xf32>
      %13 = arith.truncf %12 : vector<256x256xf32> to vector<256x256xbf16>
      %c0_12 = arith.constant 0 : index
      %c0_13 = arith.constant 0 : index
      %14 = vector.load %arg5[%c0_12, %c0_13] : memref<256x256xbf16, #tpu.memory_space<vmem>>, vector<256x256xbf16>
      tpu.vector_store %arg5[%c0_12, %c0_13], %13 {strides = array<i32>} : memref<256x256xbf16, #tpu.memory_space<vmem>>, vector<256x256xbf16>,
    } else {
    }
    return
  }
  func.func @transform_0(%arg0: i32, %arg1: i32, %arg2: i32) -> (i32, i32) {
    %c0_i32 = arith.constant 0 : i32
    return %arg0, %arg2 : i32, i32
  }
  func.func @transform_1(%arg0: i32, %arg1: i32, %arg2: i32) -> (i32, i32) {
    %c0_i32 = arith.constant 0 : i32
    return %arg2, %arg1 : i32, i32
  }
  func.func @transform_2(%arg0: i32, %arg1: i32, %arg2: i32) -> (i32, i32) {
    %c0_i32 = arith.constant 0 : i32
    return %arg0, %arg1 : i32, i32
  }
}

module attributes {stable_mosaic.version = 11 : i64} {
  func.func @_matmul_bias_kernel(%arg0: i32, %arg1: i32, %arg2: i32, %arg3: memref<256x256xbf16, #tpu.memory_space<vmem>>, %arg4: memref<256x256xbf16, #tpu.memory_space<vmem>>, %arg5: memref<1x256xf32, #tpu.memory_space<vmem>>, %arg6: memref<256x256xf32, #tpu.memory_space<vmem>>, %arg7: memref<256x256xf32, #tpu.memory_space<vmem>>) attributes {dimension_semantics = [#tpu.dimension_semantics<parallel>, #tpu.dimension_semantics<parallel>, #tpu.dimension_semantics<arbitrary>], iteration_bounds = array<i64: 1, 1, 1>, scalar_prefetch = 0 : i64, scratch_operands = 1 : i64, tpu.core_type = #tpu.core_type<tc>, window_params = [{transform_indices = @transform_0, window_bounds = array<i64: 256, 256>}, {transform_indices = @transform_1, window_bounds = array<i64: 256, 256>}, {transform_indices = @transform_2, window_bounds = array<i64: 1, 256>}, {transform_indices = @transform_3, window_bounds = array<i64: 256, 256>}]} {
    %c0_i32 = arith.constant 0 : i32
    %0 = arith.cmpi eq, %arg2, %c0_i32 : i32
    %1 = arith.extui %0 : i1 to i32
    %c0_i32_0 = arith.constant 0 : i32
    %2 = arith.cmpi ne, %1, %c0_i32_0 : i32
    scf.if %2 {
      %cst_10 = arith.constant 0.000000e+00 : f32
      %12 = vector.broadcast %cst_10 : f32 to vector<256x256xf32>
      %c0_11 = arith.constant 0 : index
      %c0_12 = arith.constant 0 : index
      %13 = vector.load %arg7[%c0_11, %c0_12] : memref<256x256xf32, #tpu.memory_space<vmem>>, vector<256x256xf32>
      tpu.vector_store %arg7[%c0_11, %c0_12], %12 {strides = array<i32>} : memref<256x256xf32, #tpu.memory_space<vmem>>, vector<256x256xf32>,
    } else {
    }
    %c0 = arith.constant 0 : index
    %c0_1 = arith.constant 0 : index
    %3 = vector.load %arg7[%c0, %c0_1] : memref<256x256xf32, #tpu.memory_space<vmem>>, vector<256x256xf32>
    %c0_2 = arith.constant 0 : index
    %c0_3 = arith.constant 0 : index
    %4 = vector.load %arg3[%c0_2, %c0_3] : memref<256x256xbf16, #tpu.memory_space<vmem>>, vector<256x256xbf16>
    %c0_4 = arith.constant 0 : index
    %c0_5 = arith.constant 0 : index
    %5 = vector.load %arg4[%c0_4, %c0_5] : memref<256x256xbf16, #tpu.memory_space<vmem>>, vector<256x256xbf16>
    %cst = arith.constant dense<0.000000e+00> : vector<256x256xf32>
    %6 = tpu.matmul %4, %5, %cst {dimension_numbers = #tpu.dot_dimension_numbers<[1], [0], [0], [1], [0, 0, 1, 1], [], []>} : vector<256x256xbf16>, vector<256x256xbf16>, vector<256x256xf32> -> vector<256x256xf32>
    %7 = arith.addf %3, %6 : vector<256x256xf32>
    %c0_6 = arith.constant 0 : index
    %c0_7 = arith.constant 0 : index
    %8 = vector.load %arg7[%c0_6, %c0_7] : memref<256x256xf32, #tpu.memory_space<vmem>>, vector<256x256xf32>
    tpu.vector_store %arg7[%c0_6, %c0_7], %7 {strides = array<i32>} : memref<256x256xf32, #tpu.memory_space<vmem>>, vector<256x256xf32>,
    %c0_i32_8 = arith.constant 0 : i32
    %9 = arith.cmpi eq, %arg2, %c0_i32_8 : i32
    %10 = arith.extui %9 : i1 to i32
    %c0_i32_9 = arith.constant 0 : i32
    %11 = arith.cmpi ne, %10, %c0_i32_9 : i32
    scf.if %11 {
      %c0_10 = arith.constant 0 : index
      %c0_11 = arith.constant 0 : index
      %12 = vector.load %arg7[%c0_10, %c0_11] : memref<256x256xf32, #tpu.memory_space<vmem>>, vector<256x256xf32>
      %c0_12 = arith.constant 0 : index
      %c0_13 = arith.constant 0 : index
      %13 = vector.load %arg5[%c0_12, %c0_13] : memref<1x256xf32, #tpu.memory_space<vmem>>, vector<1x256xf32>
      %14 = vector.broadcast %13 : vector<1x256xf32> to vector<256x256xf32>
      %15 = arith.addf %12, %14 : vector<256x256xf32>
      %c0_14 = arith.constant 0 : index
      %c0_15 = arith.constant 0 : index
      %16 = vector.load %arg6[%c0_14, %c0_15] : memref<256x256xf32, #tpu.memory_space<vmem>>, vector<256x256xf32>
      tpu.vector_store %arg6[%c0_14, %c0_15], %15 {strides = array<i32>} : memref<256x256xf32, #tpu.memory_space<vmem>>, vector<256x256xf32>,
    } else {
    }
    return
  }
  func.func @transform_0(%arg0: i32, %arg1: i32, %arg2: i32) -> (i32, i32) {
    %c0_i32 = arith.constant 0 : i32
    return %arg0, %arg2 : i32, i32
  }
  func.func @transform_1(%arg0: i32, %arg1: i32, %arg2: i32) -> (i32, i32) {
    %c0_i32 = arith.constant 0 : i32
    return %arg2, %arg1 : i32, i32
  }
  func.func @transform_2(%arg0: i32, %arg1: i32, %arg2: i32) -> (i32, i32) {
    %c0_i32 = arith.constant 0 : i32
    %c0_i32_0 = arith.constant 0 : i32
    return %c0_i32, %arg1 : i32, i32
  }
  func.func @transform_3(%arg0: i32, %arg1: i32, %arg2: i32) -> (i32, i32) {
    %c0_i32 = arith.constant 0 : i32
    return %arg0, %arg1 : i32, i32
  }
}

</mosaic_0001>

<bundles_post_ra>
// kernel: graph_convolution.3
= control target key start
LH: loop header
LB: loop body
LE: loop exit
PB: predicated region body
PF: predicated region fallthrough
CT: control target
= control target key end

     0   :  { %s1729_s1 = inlined_call_operand.vmem [shape: bf16[256,256], index: 1, kind: input, shape index: {}]   ;;  %s1730_s0 = inlined_call_operand.vmem [shape: bf16[256,256], index: 0, kind: input, shape index: {}]   ;;  %s1731_s2 = inlined_call_operand.vmem [shape: f32[1,256], index: 2, kind: input, shape index: {}]   ;;  %s1732_s3 = inlined_call_operand.vmem [shape: f32[256,256], index: 3, kind: output, shape index: {}]  }
   0x1   :  { %v1158_v0 = vld [vmem:[%s1729_s1 + $0x4] ss:$8 sps:$4 sm:$0xff]   ;;  %v1160_v1 = vld [vmem:[%s1729_s1] ss:$8 sps:$4 sm:$0xff]   ;;  %v1161_v2 = vld [vmem:[%s1729_s1 + $0x14] ss:$8 sps:$4 sm:$0xff]  }
   0x2   :  { %530 = vmatprep.subr.bf16.mxu0 %v1158_v0  ;;  %1126 = vmatprep.subr.bf16.mxu1 %v1158_v0  ;;  %v1163_v3 = vld [vmem:[%s1729_s1 + $0x10] ss:$8 sps:$4 sm:$0xff]   ;;  %v1164_v4 = vld [vmem:[%s1729_s1 + $0x24] ss:$8 sps:$4 sm:$0xff]   ;;  %v1166_v5 = vld [vmem:[%s1729_s1 + $0x20] ss:$8 sps:$4 sm:$0xff]   ;;  %v920_v0 = vlaneseq }
   0x3   :  { %531 = vmatpush1.bf16.msra.mxu0 %v1160_v1  ;;  %1142 = vmatpush1.bf16.msra.mxu1 %v1160_v1  ;;  %v1167_v6 = vld [vmem:[%s1729_s1 + $0x34] ss:$8 sps:$4 sm:$0xff]   ;;  %v1169_v7 = vld [vmem:[%s1729_s1 + $0x30] ss:$8 sps:$4 sm:$0xff]   ;;  %v1170_v8 = vld [vmem:[%s1729_s1 + $0x44] ss:$8 sps:$4 sm:$0xff]  }
   0x4   :  { %532 = vmatprep.subr.bf16.mxu0 %v1161_v2  ;;  %1127 = vmatprep.subr.bf16.mxu1 %v1161_v2  ;;  %v1172_v9 = vld [vmem:[%s1729_s1 + $0x40] ss:$8 sps:$4 sm:$0xff]   ;;  %v1173_v10 = vld [vmem:[%s1729_s1 + $0x54] ss:$8 sps:$4 sm:$0xff]   ;;  %v1175_v11 = vld [vmem:[%s1729_s1 + $0x50] ss:$8 sps:$4 sm:$0xff]  }
   0x5   :  { %v1176_v12 = vld [vmem:[%s1729_s1 + $0x64] ss:$8 sps:$4 sm:$0xff]   ;;  %v1178_v14 = vld [vmem:[%s1729_s1 + $0x60] ss:$8 sps:$4 sm:$0xff]   ;;  %v1179_v16 = vld [vmem:[%s1729_s1 + $0x74] ss:$8 sps:$4 sm:$0xff]  }
   0x6   :  { %v1208_v13 = vld [vmem:[%s1730_s0 + $0x4] ss:$8 sps:$4 sm:$0xff]   ;;  %v1181_v17 = vld [vmem:[%s1729_s1 + $0x70] ss:$8 sps:$4 sm:$0xff]   ;;  %v1184_v19 = vld [vmem:[%s1729_s1 + $0x80] ss:$8 sps:$4 sm:$0xff]  }
   0x7   :  { %533 = vmatpush1.bf16.msra.mxu0 %v1163_v3  ;;  %1143 = vmatpush1.bf16.msra.mxu1 %v1163_v3  ;;  %v1211_v15 = vld [vmem:[%s1730_s0 + $0x84] ss:$8 sps:$4 sm:$0xff]   ;;  %v1185_v20 = vld [vmem:[%s1729_s1 + $0x94] ss:$8 sps:$4 sm:$0xff]   ;;  %v1187_v21 = vld [vmem:[%s1729_s1 + $0x90] ss:$8 sps:$4 sm:$0xff]  }
   0x8   :  { %534 = vmatprep.subr.bf16.mxu0 %v1164_v4  ;;  %1128 = vmatprep.subr.bf16.mxu1 %v1164_v4  ;;  %v1182_v18 = vld [vmem:[%s1729_s1 + $0x84] ss:$8 sps:$4 sm:$0xff]   ;;  %v1190_v23 = vld [vmem:[%s1729_s1 + $0xa0] ss:$8 sps:$4 sm:$0xff]   ;;  %v1191_v24 = vld [vmem:[%s1729_s1 + $0xb4] ss:$8 sps:$4 sm:$0xff]  }
   0x9   :  { %562 = vmatprep.mubr.bf16.mxu0 %v1208_v13  ;;  %642 = vmatprep.mubr.bf16.mxu1 %v1211_v15  ;;  %v1188_v22 = vld [vmem:[%s1729_s1 + $0xa4] ss:$8 sps:$4 sm:$0xff]   ;;  %v1193_v25 = vld [vmem:[%s1729_s1 + $0xb0] ss:$8 sps:$4 sm:$0xff]   ;;  %v1196_v27 = vld [vmem:[%s1729_s1 + $0xc0] ss:$8 sps:$4 sm:$0xff]  }
   0xa   :  { %v1194_v26 = vld [vmem:[%s1729_s1 + $0xc4] ss:$8 sps:$4 sm:$0xff]   ;;  %v1197_v28 = vld [vmem:[%s1729_s1 + $0xd4] ss:$8 sps:$4 sm:$0xff]   ;;  %v1199_v29 = vld [vmem:[%s1729_s1 + $0xd0] ss:$8 sps:$4 sm:$0xff]  }
   0xb   :  { %535 = vmatpush1.bf16.msra.mxu0 %v1166_v5  ;;  %1144 = vmatpush1.bf16.msra.mxu1 %v1166_v5  ;;  %v1200_v30 = vld [vmem:[%s1729_s1 + $0xe4] ss:$8 sps:$4 sm:$0xff]   ;;  %v1202_v31 = vld [vmem:[%s1729_s1 + $0xe0] ss:$8 sps:$4 sm:$0xff]   ;;  %v1203_v32 = vld [vmem:[%s1729_s1 + $0xf4] ss:$8 sps:$4 sm:$0xff]  }
   0xc   :  { %536 = vmatprep.subr.bf16.mxu0 %v1167_v6  ;;  %1129 = vmatprep.subr.bf16.mxu1 %v1167_v6  ;;  %v1205_v33 = vld [vmem:[%s1729_s1 + $0xf0] ss:$8 sps:$4 sm:$0xff]   ;;  %v1206_v34 = vld [vmem:[%s1730_s0] ss:$8 sps:$4 sm:$0xff]   ;;  %v1212_v36 = vld [vmem:[%s1730_s0 + $0x14] ss:$8 sps:$4 sm:$0xff]  }
   0xd   :  { %v1209_v35 = vld [vmem:[%s1730_s0 + $0x80] ss:$8 sps:$4 sm:$0xff]   ;;  %v1214_v37 = vld [vmem:[%s1730_s0 + $0x94] ss:$8 sps:$4 sm:$0xff]   ;;  %v1216_v38 = vld [vmem:[%s1730_s0 + $0x10] ss:$8 sps:$4 sm:$0xff]  }
   0xe   :  { %v1217_v39 = vld [vmem:[%s1730_s0 + $0x90] ss:$8 sps:$4 sm:$0xff]   ;;  %v1218_v40 = vld [vmem:[%s1730_s0 + $0x24] ss:$8 sps:$4 sm:$0xff]   ;;  %v1222_v42 = vld [vmem:[%s1730_s0 + $0x20] ss:$8 sps:$4 sm:$0xff]  }
   0xf   :  { %537 = vmatpush1.bf16.msra.mxu0 %v1169_v7  ;;  %1145 = vmatpush1.bf16.msra.mxu1 %v1169_v7  ;;  %v1220_v41 = vld [vmem:[%s1730_s0 + $0xa4] ss:$8 sps:$4 sm:$0xff]   ;;  %v1223_v43 = vld [vmem:[%s1730_s0 + $0xa0] ss:$8 sps:$4 sm:$0xff]   ;;  %v1224_v44 = vld [vmem:[%s1730_s0 + $0x34] ss:$8 sps:$4 sm:$0xff]  }
  0x10   :  { %538 = vmatprep.subr.bf16.mxu0 %v1170_v8  ;;  %1130 = vmatprep.subr.bf16.mxu1 %v1170_v8  ;;  %v1226_v45 = vld [vmem:[%s1730_s0 + $0xb4] ss:$8 sps:$4 sm:$0xff]   ;;  %v1228_v46 = vld [vmem:[%s1730_s0 + $0x30] ss:$8 sps:$4 sm:$0xff]   ;;  %v1230_v48 = vld [vmem:[%s1730_s0 + $0x44] ss:$8 sps:$4 sm:$0xff]  }
  0x11   :  { %v1229_v47 = vld [vmem:[%s1730_s0 + $0xb0] ss:$8 sps:$4 sm:$0xff]   ;;  %v1232_v49 = vld [vmem:[%s1730_s0 + $0xc4] ss:$8 sps:$4 sm:$0xff]   ;;  %v1234_v50 = vld [vmem:[%s1730_s0 + $0x40] ss:$8 sps:$4 sm:$0xff]  }
  0x12   :  { %v1235_v51 = vld [vmem:[%s1730_s0 + $0xc0] ss:$8 sps:$4 sm:$0xff]   ;;  %v1236_v52 = vld [vmem:[%s1730_s0 + $0x54] ss:$8 sps:$4 sm:$0xff]   ;;  %v1240_v54 = vld [vmem:[%s1730_s0 + $0x50] ss:$8 sps:$4 sm:$0xff]  }
  0x13   :  { %539 = vmatpush1.bf16.msra.mxu0 %v1172_v9  ;;  %1146 = vmatpush1.bf16.msra.mxu1 %v1172_v9  ;;  %v1238_v53 = vld [vmem:[%s1730_s0 + $0xd4] ss:$8 sps:$4 sm:$0xff]   ;;  %v1241_v55 = vld [vmem:[%s1730_s0 + $0xd0] ss:$8 sps:$4 sm:$0xff]   ;;  %v1242_v56 = vld [vmem:[%s1730_s0 + $0x64] ss:$8 sps:$4 sm:$0xff]  }
  0x14   :  { %540 = vmatprep.subr.bf16.mxu0 %v1173_v10  ;;  %1131 = vmatprep.subr.bf16.mxu1 %v1173_v10  ;;  %v1244_v57 = vld [vmem:[%s1730_s0 + $0xe4] ss:$8 sps:$4 sm:$0xff]   ;;  %v1246_v58 = vld [vmem:[%s1730_s0 + $0x60] ss:$8 sps:$4 sm:$0xff]   ;;  %v1248_v60 = vld [vmem:[%s1730_s0 + $0x74] ss:$8 sps:$4 sm:$0xff]  }
  0x15   :  { %v1247_v59 = vld [vmem:[%s1730_s0 + $0xe0] ss:$8 sps:$4 sm:$0xff]   ;;  %v1250_v61 = vld [vmem:[%s1730_s0 + $0xf4] ss:$8 sps:$4 sm:$0xff]   ;;  %v1252_v62 = vld [vmem:[%s1730_s0 + $0x70] ss:$8 sps:$4 sm:$0xff]  }
  0x16   :  { %v1253_v63 = vld [vmem:[%s1730_s0 + $0xf0] ss:$8 sps:$4 sm:$0xff]   ;;  %v921_v1 = vshrl.u32 %v920_v0, 7  ;;  %v918_v3 = vld [vmem:[%s1731_s2] sm:$0x3] }
  0x17   :  { %541 = vmatpush1.bf16.msra.mxu0 %v1175_v11  ;;  %1147 = vmatpush1.bf16.msra.mxu1 %v1175_v11 }
  0x18   :  { %542 = vmatprep.subr.bf16.mxu0 %v1176_v12  ;;  %1132 = vmatprep.subr.bf16.mxu1 %v1176_v12  ;;  %v922_v2 = vsub.s32 0, %v921_v1  ;;  %v926_v4 = vsub.s32 1, %v921_v1 }
  0x1a   :  { %v1469_v5 = vrot.slane %v918_v3, %v922_v2  ;;  %v1471_v6 = vrot.slane %v918_v3, %v926_v4 }
  0x1b   :  { %543 = vmatpush1.bf16.msra.mxu0 %v1178_v14  ;;  %1148 = vmatpush1.bf16.msra.mxu1 %v1178_v14 }
  0x1c   :  { %544 = vmatprep.subr.bf16.mxu0 %v1179_v16  ;;  %1133 = vmatprep.subr.bf16.mxu1 %v1179_v16 }
  0x1f   :  { %545 = vmatpush1.bf16.msra.mxu0 %v1181_v17  ;;  %1149 = vmatpush1.bf16.msra.mxu1 %v1181_v17 }
  0x20   :  { %546 = vmatprep.subr.bf16.mxu0 %v1182_v18  ;;  %1134 = vmatprep.subr.bf16.mxu1 %v1182_v18 }
  0x23   :  { %547 = vmatpush1.bf16.msra.mxu0 %v1184_v19  ;;  %1150 = vmatpush1.bf16.msra.mxu1 %v1184_v19 }
  0x24   :  { %548 = vmatprep.subr.bf16.mxu0 %v1185_v20  ;;  %1135 = vmatprep.subr.bf16.mxu1 %v1185_v20 }
  0x27   :  { %549 = vmatpush1.bf16.msra.mxu0 %v1187_v21  ;;  %1151 = vmatpush1.bf16.msra.mxu1 %v1187_v21 }
  0x28   :  { %550 = vmatprep.subr.bf16.mxu0 %v1188_v22  ;;  %1136 = vmatprep.subr.bf16.mxu1 %v1188_v22 }
  0x2b   :  { %551 = vmatpush1.bf16.msra.mxu0 %v1190_v23  ;;  %1152 = vmatpush1.bf16.msra.mxu1 %v1190_v23 }
  0x2c   :  { %552 = vmatprep.subr.bf16.mxu0 %v1191_v24  ;;  %1137 = vmatprep.subr.bf16.mxu1 %v1191_v24 }
  0x2f   :  { %553 = vmatpush1.bf16.msra.mxu0 %v1193_v25  ;;  %1153 = vmatpush1.bf16.msra.mxu1 %v1193_v25 }
  0x30   :  { %554 = vmatprep.subr.bf16.mxu0 %v1194_v26  ;;  %1138 = vmatprep.subr.bf16.mxu1 %v1194_v26 }
  0x33   :  { %555 = vmatpush1.bf16.msra.mxu0 %v1196_v27  ;;  %1154 = vmatpush1.bf16.msra.mxu1 %v1196_v27 }
  0x34   :  { %556 = vmatprep.subr.bf16.mxu0 %v1197_v28  ;;  %1139 = vmatprep.subr.bf16.mxu1 %v1197_v28 }
  0x37   :  { %557 = vmatpush1.bf16.msra.mxu0 %v1199_v29  ;;  %1155 = vmatpush1.bf16.msra.mxu1 %v1199_v29 }
  0x38   :  { %558 = vmatprep.subr.bf16.mxu0 %v1200_v30  ;;  %1140 = vmatprep.subr.bf16.mxu1 %v1200_v30 }
  0x3b   :  { %559 = vmatpush1.bf16.msra.mxu0 %v1202_v31  ;;  %1156 = vmatpush1.bf16.msra.mxu1 %v1202_v31 }
  0x3c   :  { %560 = vmatprep.subr.bf16.mxu0 %v1203_v32  ;;  %1141 = vmatprep.subr.bf16.mxu1 %v1203_v32 }
  0x3f   :  { %561 = vmatpush1.bf16.msra.mxu0 %v1205_v33  ;;  %1157 = vmatpush1.bf16.msra.mxu1 %v1205_v33 }
  0x42   :  { %563 = vmatmul.mubr.bf16.vlgmr.msra.gmra.mrb[0].mxu0 %v1206_v34  ;;  %643 = vmatmul.mubr.bf16.vlgmr.msra.gmra.mrb[0].mxu1 %v1209_v35 }
  0x43   :  { %572 = vmatprep.mubr.bf16.mxu0 %v1212_v36  ;;  %652 = vmatprep.mubr.bf16.mxu1 %v1214_v37 }
  0x4a   :  { %573 = vmatmul.mubr.bf16.gmra.mrb[4].mxu0 %v1216_v38  ;;  %653 = vmatmul.mubr.bf16.gmra.mrb[4].mxu1 %v1217_v39 }
  0x4b   :  { %582 = vmatprep.mubr.bf16.mxu0 %v1218_v40  ;;  %662 = vmatprep.mubr.bf16.mxu1 %v1220_v41 }
  0x52   :  { %583 = vmatmul.mubr.bf16.gmra.mrb[8].mxu0 %v1222_v42  ;;  %663 = vmatmul.mubr.bf16.gmra.mrb[8].mxu1 %v1223_v43 }
  0x53   :  { %592 = vmatprep.mubr.bf16.mxu0 %v1224_v44  ;;  %672 = vmatprep.mubr.bf16.mxu1 %v1226_v45 }
  0x5a   :  { %593 = vmatmul.mubr.bf16.gmra.mrb[12].mxu0 %v1228_v46  ;;  %673 = vmatmul.mubr.bf16.gmra.mrb[12].mxu1 %v1229_v47 }
  0x5b   :  { %602 = vmatprep.mubr.bf16.mxu0 %v1230_v48  ;;  %682 = vmatprep.mubr.bf16.mxu1 %v1232_v49 }
  0x62   :  { %603 = vmatmul.mubr.bf16.gmra.mrb[16].mxu0 %v1234_v50  ;;  %683 = vmatmul.mubr.bf16.gmra.mrb[16].mxu1 %v1235_v51 }
  0x63   :  { %612 = vmatprep.mubr.bf16.mxu0 %v1236_v52  ;;  %692 = vmatprep.mubr.bf16.mxu1 %v1238_v53 }
  0x6a   :  { %613 = vmatmul.mubr.bf16.gmra.mrb[20].mxu0 %v1240_v54  ;;  %693 = vmatmul.mubr.bf16.gmra.mrb[20].mxu1 %v1241_v55 }
  0x6b   :  { %622 = vmatprep.mubr.bf16.mxu0 %v1242_v56  ;;  %702 = vmatprep.mubr.bf16.mxu1 %v1244_v57 }
  0x72   :  { %623 = vmatmul.mubr.bf16.gmra.mrb[24].mxu0 %v1246_v58  ;;  %703 = vmatmul.mubr.bf16.gmra.mrb[24].mxu1 %v1247_v59 }
  0x73   :  { %632 = vmatprep.mubr.bf16.mxu0 %v1248_v60  ;;  %712 = vmatprep.mubr.bf16.mxu1 %v1250_v61 }
  0x7a   :  { %633 = vmatmul.mubr.bf16.gmra.mrb[28].mxu0 %v1252_v62  ;;  %713 = vmatmul.mubr.bf16.gmra.mrb[28].mxu1 %v1253_v63 }
 0x115   :  { %v564_v7 = vpop.f32.mrb[0].mxu0  ;;  %v644_v8 = vpop.f32.mrb[0].mxu1 }
 0x116   :  { %v930_v9 = vadd.f32 %v1469_v5, %v564_v7  ;;  %v962_v10 = vadd.f32 %v1469_v5, %v644_v8  ;;  %v566_v11 = vpop.f32.mrb[1].mxu0  ;;  %v646_v12 = vpop.f32.mrb[1].mxu1 }
 0x117   :  { %v931_v13 = vadd.f32 %v1471_v6, %v566_v11  ;;  %v963_v14 = vadd.f32 %v1471_v6, %v646_v12  ;;  %v568_v15 = vpop.f32.mrb[2].mxu0  ;;  %v648_v16 = vpop.f32.mrb[2].mxu1 }
 0x118   :  { %994 = vst [vmem:[%s1732_s3] sm:$0xff] %v930_v9  ;;  %1026 = vst [vmem:[%s1732_s3 + $0x100] sm:$0xff] %v962_v10  ;;  %v932_v17 = vadd.f32 %v1469_v5, %v568_v15  ;;  %v964_v18 = vadd.f32 %v1469_v5, %v648_v16  ;;  %v570_v19 = vpop.f32.mrb[3].mxu0  ;;  %v650_v20 = vpop.f32.mrb[3].mxu1 }
 0x119   :  { %995 = vst [vmem:[%s1732_s3 + $0x8] sm:$0xff] %v931_v13  ;;  %1027 = vst [vmem:[%s1732_s3 + $0x108] sm:$0xff] %v963_v14  ;;  %v933_v21 = vadd.f32 %v1471_v6, %v570_v19  ;;  %v965_v22 = vadd.f32 %v1471_v6, %v650_v20 }
 0x11a   :  { %996 = vst [vmem:[%s1732_s3 + $0x10] sm:$0xff] %v932_v17  ;;  %1028 = vst [vmem:[%s1732_s3 + $0x110] sm:$0xff] %v964_v18 }
 0x11b   :  { %997 = vst [vmem:[%s1732_s3 + $0x18] sm:$0xff] %v933_v21  ;;  %1029 = vst [vmem:[%s1732_s3 + $0x118] sm:$0xff] %v965_v22 }
 0x11d   :  { %v574_v23 = vpop.f32.mrb[4].mxu0  ;;  %v654_v24 = vpop.f32.mrb[4].mxu1 }
 0x11e   :  { %v934_v25 = vadd.f32 %v1469_v5, %v574_v23  ;;  %v966_v26 = vadd.f32 %v1469_v5, %v654_v24  ;;  %v576_v27 = vpop.f32.mrb[5].mxu0  ;;  %v656_v28 = vpop.f32.mrb[5].mxu1 }
 0x11f   :  { %v935_v29 = vadd.f32 %v1471_v6, %v576_v27  ;;  %v967_v30 = vadd.f32 %v1471_v6, %v656_v28  ;;  %v578_v31 = vpop.f32.mrb[6].mxu0  ;;  %v658_v32 = vpop.f32.mrb[6].mxu1 }
 0x120   :  { %998 = vst [vmem:[%s1732_s3 + $0x20] sm:$0xff] %v934_v25  ;;  %1030 = vst [vmem:[%s1732_s3 + $0x120] sm:$0xff] %v966_v26  ;;  %v936_v33 = vadd.f32 %v1469_v5, %v578_v31  ;;  %v968_v34 = vadd.f32 %v1469_v5, %v658_v32  ;;  %v580_v35 = vpop.f32.mrb[7].mxu0  ;;  %v660_v36 = vpop.f32.mrb[7].mxu1 }
 0x121   :  { %999 = vst [vmem:[%s1732_s3 + $0x28] sm:$0xff] %v935_v29  ;;  %1031 = vst [vmem:[%s1732_s3 + $0x128] sm:$0xff] %v967_v30  ;;  %v937_v37 = vadd.f32 %v1471_v6, %v580_v35  ;;  %v969_v38 = vadd.f32 %v1471_v6, %v660_v36 }
 0x122   :  { %1000 = vst [vmem:[%s1732_s3 + $0x30] sm:$0xff] %v936_v33  ;;  %1032 = vst [vmem:[%s1732_s3 + $0x130] sm:$0xff] %v968_v34 }
 0x123   :  { %1001 = vst [vmem:[%s1732_s3 + $0x38] sm:$0xff] %v937_v37  ;;  %1033 = vst [vmem:[%s1732_s3 + $0x138] sm:$0xff] %v969_v38 }
 0x125   :  { %v584_v39 = vpop.f32.mrb[8].mxu0  ;;  %v664_v40 = vpop.f32.mrb[8].mxu1 }
 0x126   :  { %v938_v41 = vadd.f32 %v1469_v5, %v584_v39  ;;  %v970_v42 = vadd.f32 %v1469_v5, %v664_v40  ;;  %v586_v43 = vpop.f32.mrb[9].mxu0  ;;  %v666_v44 = vpop.f32.mrb[9].mxu1 }
 0x127   :  { %v939_v45 = vadd.f32 %v1471_v6, %v586_v43  ;;  %v971_v46 = vadd.f32 %v1471_v6, %v666_v44  ;;  %v588_v47 = vpop.f32.mrb[10].mxu0  ;;  %v668_v48 = vpop.f32.mrb[10].mxu1 }
 0x128   :  { %1002 = vst [vmem:[%s1732_s3 + $0x40] sm:$0xff] %v938_v41  ;;  %1034 = vst [vmem:[%s1732_s3 + $0x140] sm:$0xff] %v970_v42  ;;  %v940_v49 = vadd.f32 %v1469_v5, %v588_v47  ;;  %v972_v50 = vadd.f32 %v1469_v5, %v668_v48  ;;  %v590_v51 = vpop.f32.mrb[11].mxu0  ;;  %v670_v52 = vpop.f32.mrb[11].mxu1 }
 0x129   :  { %1003 = vst [vmem:[%s1732_s3 + $0x48] sm:$0xff] %v939_v45  ;;  %1035 = vst [vmem:[%s1732_s3 + $0x148] sm:$0xff] %v971_v46  ;;  %v941_v53 = vadd.f32 %v1471_v6, %v590_v51  ;;  %v973_v54 = vadd.f32 %v1471_v6, %v670_v52 }
 0x12a   :  { %1004 = vst [vmem:[%s1732_s3 + $0x50] sm:$0xff] %v940_v49  ;;  %1036 = vst [vmem:[%s1732_s3 + $0x150] sm:$0xff] %v972_v50 }
 0x12b   :  { %1005 = vst [vmem:[%s1732_s3 + $0x58] sm:$0xff] %v941_v53  ;;  %1037 = vst [vmem:[%s1732_s3 + $0x158] sm:$0xff] %v973_v54 }
 0x12d   :  { %v594_v55 = vpop.f32.mrb[12].mxu0  ;;  %v674_v56 = vpop.f32.mrb[12].mxu1 }
 0x12e   :  { %v942_v57 = vadd.f32 %v1469_v5, %v594_v55  ;;  %v974_v58 = vadd.f32 %v1469_v5, %v674_v56  ;;  %v596_v59 = vpop.f32.mrb[13].mxu0  ;;  %v676_v60 = vpop.f32.mrb[13].mxu1 }
 0x12f   :  { %v943_v61 = vadd.f32 %v1471_v6, %v596_v59  ;;  %v975_v62 = vadd.f32 %v1471_v6, %v676_v60  ;;  %v598_v63 = vpop.f32.mrb[14].mxu0  ;;  %v678_v0 = vpop.f32.mrb[14].mxu1 }
 0x130   :  { %1006 = vst [vmem:[%s1732_s3 + $0x60] sm:$0xff] %v942_v57  ;;  %1038 = vst [vmem:[%s1732_s3 + $0x160] sm:$0xff] %v974_v58  ;;  %v944_v1 = vadd.f32 %v1469_v5, %v598_v63  ;;  %v976_v2 = vadd.f32 %v1469_v5, %v678_v0  ;;  %v600_v3 = vpop.f32.mrb[15].mxu0  ;;  %v680_v4 = vpop.f32.mrb[15].mxu1 }
 0x131   :  { %1007 = vst [vmem:[%s1732_s3 + $0x68] sm:$0xff] %v943_v61  ;;  %1039 = vst [vmem:[%s1732_s3 + $0x168] sm:$0xff] %v975_v62  ;;  %v945_v7 = vadd.f32 %v1471_v6, %v600_v3  ;;  %v977_v8 = vadd.f32 %v1471_v6, %v680_v4 }
 0x132   :  { %1008 = vst [vmem:[%s1732_s3 + $0x70] sm:$0xff] %v944_v1  ;;  %1040 = vst [vmem:[%s1732_s3 + $0x170] sm:$0xff] %v976_v2 }
 0x133   :  { %1009 = vst [vmem:[%s1732_s3 + $0x78] sm:$0xff] %v945_v7  ;;  %1041 = vst [vmem:[%s1732_s3 + $0x178] sm:$0xff] %v977_v8 }
 0x135   :  { %v604_v9 = vpop.f32.mrb[16].mxu0  ;;  %v684_v10 = vpop.f32.mrb[16].mxu1 }
 0x136   :  { %v946_v11 = vadd.f32 %v1469_v5, %v604_v9  ;;  %v978_v12 = vadd.f32 %v1469_v5, %v684_v10  ;;  %v606_v13 = vpop.f32.mrb[17].mxu0  ;;  %v686_v14 = vpop.f32.mrb[17].mxu1 }
 0x137   :  { %v947_v15 = vadd.f32 %v1471_v6, %v606_v13  ;;  %v979_v16 = vadd.f32 %v1471_v6, %v686_v14  ;;  %v608_v17 = vpop.f32.mrb[18].mxu0  ;;  %v688_v18 = vpop.f32.mrb[18].mxu1 }
 0x138   :  { %1010 = vst [vmem:[%s1732_s3 + $0x80] sm:$0xff] %v946_v11  ;;  %1042 = vst [vmem:[%s1732_s3 + $0x180] sm:$0xff] %v978_v12  ;;  %v948_v19 = vadd.f32 %v1469_v5, %v608_v17  ;;  %v980_v20 = vadd.f32 %v1469_v5, %v688_v18  ;;  %v610_v21 = vpop.f32.mrb[19].mxu0  ;;  %v690_v22 = vpop.f32.mrb[19].mxu1 }
 0x139   :  { %1011 = vst [vmem:[%s1732_s3 + $0x88] sm:$0xff] %v947_v15  ;;  %1043 = vst [vmem:[%s1732_s3 + $0x188] sm:$0xff] %v979_v16  ;;  %v949_v23 = vadd.f32 %v1471_v6, %v610_v21  ;;  %v981_v24 = vadd.f32 %v1471_v6, %v690_v22 }
 0x13a   :  { %1012 = vst [vmem:[%s1732_s3 + $0x90] sm:$0xff] %v948_v19  ;;  %1044 = vst [vmem:[%s1732_s3 + $0x190] sm:$0xff] %v980_v20 }
 0x13b   :  { %1013 = vst [vmem:[%s1732_s3 + $0x98] sm:$0xff] %v949_v23  ;;  %1045 = vst [vmem:[%s1732_s3 + $0x198] sm:$0xff] %v981_v24 }
 0x13d   :  { %v614_v25 = vpop.f32.mrb[20].mxu0  ;;  %v694_v26 = vpop.f32.mrb[20].mxu1 }
 0x13e   :  { %v950_v27 = vadd.f32 %v1469_v5, %v614_v25  ;;  %v982_v28 = vadd.f32 %v1469_v5, %v694_v26  ;;  %v616_v29 = vpop.f32.mrb[21].mxu0  ;;  %v696_v30 = vpop.f32.mrb[21].mxu1 }
 0x13f   :  { %v951_v31 = vadd.f32 %v1471_v6, %v616_v29  ;;  %v983_v32 = vadd.f32 %v1471_v6, %v696_v30  ;;  %v618_v33 = vpop.f32.mrb[22].mxu0  ;;  %v698_v34 = vpop.f32.mrb[22].mxu1 }
 0x140   :  { %1014 = vst [vmem:[%s1732_s3 + $0xa0] sm:$0xff] %v950_v27  ;;  %1046 = vst [vmem:[%s1732_s3 + $0x1a0] sm:$0xff] %v982_v28  ;;  %v952_v35 = vadd.f32 %v1469_v5, %v618_v33  ;;  %v984_v36 = vadd.f32 %v1469_v5, %v698_v34  ;;  %v620_v37 = vpop.f32.mrb[23].mxu0  ;;  %v700_v38 = vpop.f32.mrb[23].mxu1 }
 0x141   :  { %1015 = vst [vmem:[%s1732_s3 + $0xa8] sm:$0xff] %v951_v31  ;;  %1047 = vst [vmem:[%s1732_s3 + $0x1a8] sm:$0xff] %v983_v32  ;;  %v953_v39 = vadd.f32 %v1471_v6, %v620_v37  ;;  %v985_v40 = vadd.f32 %v1471_v6, %v700_v38 }
 0x142   :  { %1016 = vst [vmem:[%s1732_s3 + $0xb0] sm:$0xff] %v952_v35  ;;  %1048 = vst [vmem:[%s1732_s3 + $0x1b0] sm:$0xff] %v984_v36 }
 0x143   :  { %1017 = vst [vmem:[%s1732_s3 + $0xb8] sm:$0xff] %v953_v39  ;;  %1049 = vst [vmem:[%s1732_s3 + $0x1b8] sm:$0xff] %v985_v40 }
 0x145   :  { %v624_v41 = vpop.f32.mrb[24].mxu0  ;;  %v704_v42 = vpop.f32.mrb[24].mxu1 }
 0x146   :  { %v954_v43 = vadd.f32 %v1469_v5, %v624_v41  ;;  %v986_v44 = vadd.f32 %v1469_v5, %v704_v42  ;;  %v626_v45 = vpop.f32.mrb[25].mxu0  ;;  %v706_v46 = vpop.f32.mrb[25].mxu1 }
 0x147   :  { %v955_v47 = vadd.f32 %v1471_v6, %v626_v45  ;;  %v987_v48 = vadd.f32 %v1471_v6, %v706_v46  ;;  %v628_v49 = vpop.f32.mrb[26].mxu0  ;;  %v708_v50 = vpop.f32.mrb[26].mxu1 }
 0x148   :  { %1018 = vst [vmem:[%s1732_s3 + $0xc0] sm:$0xff] %v954_v43  ;;  %1050 = vst [vmem:[%s1732_s3 + $0x1c0] sm:$0xff] %v986_v44  ;;  %v956_v51 = vadd.f32 %v1469_v5, %v628_v49  ;;  %v988_v52 = vadd.f32 %v1469_v5, %v708_v50  ;;  %v630_v53 = vpop.f32.mrb[27].mxu0  ;;  %v710_v54 = vpop.f32.mrb[27].mxu1 }
 0x149   :  { %1019 = vst [vmem:[%s1732_s3 + $0xc8] sm:$0xff] %v955_v47  ;;  %1051 = vst [vmem:[%s1732_s3 + $0x1c8] sm:$0xff] %v987_v48  ;;  %v957_v55 = vadd.f32 %v1471_v6, %v630_v53  ;;  %v989_v56 = vadd.f32 %v1471_v6, %v710_v54 }
 0x14a   :  { %1020 = vst [vmem:[%s1732_s3 + $0xd0] sm:$0xff] %v956_v51  ;;  %1052 = vst [vmem:[%s1732_s3 + $0x1d0] sm:$0xff] %v988_v52 }
 0x14b   :  { %1021 = vst [vmem:[%s1732_s3 + $0xd8] sm:$0xff] %v957_v55  ;;  %1053 = vst [vmem:[%s1732_s3 + $0x1d8] sm:$0xff] %v989_v56 }
 0x14d   :  { %v634_v57 = vpop.f32.mrb[28].mxu0  ;;  %v714_v58 = vpop.f32.mrb[28].mxu1 }
 0x14e   :  { %v958_v59 = vadd.f32 %v1469_v5, %v634_v57  ;;  %v990_v60 = vadd.f32 %v1469_v5, %v714_v58  ;;  %v636_v61 = vpop.f32.mrb[29].mxu0  ;;  %v716_v62 = vpop.f32.mrb[29].mxu1 }
 0x14f   :  { %v959_v63 = vadd.f32 %v1471_v6, %v636_v61  ;;  %v991_v0 = vadd.f32 %v1471_v6, %v716_v62  ;;  %v638_v1 = vpop.f32.mrb[30].mxu0  ;;  %v718_v2 = vpop.f32.mrb[30].mxu1 }
 0x150   :  { %1022 = vst [vmem:[%s1732_s3 + $0xe0] sm:$0xff] %v958_v59  ;;  %1054 = vst [vmem:[%s1732_s3 + $0x1e0] sm:$0xff] %v990_v60  ;;  %v960_v3 = vadd.f32 %v1469_v5, %v638_v1  ;;  %v992_v4 = vadd.f32 %v1469_v5, %v718_v2  ;;  %v640_v7 = vpop.f32.mrb[31].mxu0  ;;  %v720_v8 = vpop.f32.mrb[31].mxu1 }
 0x151   :  { %1023 = vst [vmem:[%s1732_s3 + $0xe8] sm:$0xff] %v959_v63  ;;  %1055 = vst [vmem:[%s1732_s3 + $0x1e8] sm:$0xff] %v991_v0  ;;  %v961_v9 = vadd.f32 %v1471_v6, %v640_v7  ;;  %v993_v10 = vadd.f32 %v1471_v6, %v720_v8 }
 0x152   :  { %1024 = vst [vmem:[%s1732_s3 + $0xf0] sm:$0xff] %v960_v3  ;;  %1056 = vst [vmem:[%s1732_s3 + $0x1f0] sm:$0xff] %v992_v4 }
 0x153   :  { %1025 = vst [vmem:[%s1732_s3 + $0xf8] sm:$0xff] %v961_v9  ;;  %1057 = vst [vmem:[%s1732_s3 + $0x1f8] sm:$0xff] %v993_v10 }

// kernel: graph_convolution.2
= control target key start
LH: loop header
LB: loop body
LE: loop exit
PB: predicated region body
PF: predicated region fallthrough
CT: control target
= control target key end

     0   :  { %s1702_s1 = inlined_call_operand.vmem [shape: bf16[256,256], index: 1, kind: input, shape index: {}]   ;;  %s1703_s0 = inlined_call_operand.vmem [shape: bf16[256,256], index: 0, kind: input, shape index: {}]   ;;  %s1704_s2 = inlined_call_operand.vmem [shape: bf16[256,256], index: 2, kind: output, shape index: {}]  }
   0x1   :  { %v1303_v0 = vld [vmem:[%s1702_s1 + $0x4] ss:$8 sps:$4 sm:$0xff]   ;;  %v1305_v1 = vld [vmem:[%s1702_s1] ss:$8 sps:$4 sm:$0xff]   ;;  %v1306_v2 = vld [vmem:[%s1702_s1 + $0x14] ss:$8 sps:$4 sm:$0xff]  }
   0x2   :  { %527 = vmatprep.subr.bf16.mxu0 %v1303_v0  ;;  %1271 = vmatprep.subr.bf16.mxu1 %v1303_v0  ;;  %v1308_v3 = vld [vmem:[%s1702_s1 + $0x10] ss:$8 sps:$4 sm:$0xff]   ;;  %v1309_v4 = vld [vmem:[%s1702_s1 + $0x24] ss:$8 sps:$4 sm:$0xff]   ;;  %v1311_v5 = vld [vmem:[%s1702_s1 + $0x20] ss:$8 sps:$4 sm:$0xff]  }
   0x3   :  { %528 = vmatpush1.bf16.msra.mxu0 %v1305_v1  ;;  %1287 = vmatpush1.bf16.msra.mxu1 %v1305_v1  ;;  %v1312_v6 = vld [vmem:[%s1702_s1 + $0x34] ss:$8 sps:$4 sm:$0xff]   ;;  %v1314_v7 = vld [vmem:[%s1702_s1 + $0x30] ss:$8 sps:$4 sm:$0xff]   ;;  %v1315_v8 = vld [vmem:[%s1702_s1 + $0x44] ss:$8 sps:$4 sm:$0xff]  }
   0x4   :  { %529 = vmatprep.subr.bf16.mxu0 %v1306_v2  ;;  %1272 = vmatprep.subr.bf16.mxu1 %v1306_v2  ;;  %v1317_v9 = vld [vmem:[%s1702_s1 + $0x40] ss:$8 sps:$4 sm:$0xff]   ;;  %v1318_v10 = vld [vmem:[%s1702_s1 + $0x54] ss:$8 sps:$4 sm:$0xff]   ;;  %v1320_v11 = vld [vmem:[%s1702_s1 + $0x50] ss:$8 sps:$4 sm:$0xff]  }
   0x5   :  { %v1321_v12 = vld [vmem:[%s1702_s1 + $0x64] ss:$8 sps:$4 sm:$0xff]   ;;  %v1323_v14 = vld [vmem:[%s1702_s1 + $0x60] ss:$8 sps:$4 sm:$0xff]   ;;  %v1324_v16 = vld [vmem:[%s1702_s1 + $0x74] ss:$8 sps:$4 sm:$0xff]  }
   0x6   :  { %v1353_v13 = vld [vmem:[%s1703_s0 + $0x4] ss:$8 sps:$4 sm:$0xff]   ;;  %v1326_v17 = vld [vmem:[%s1702_s1 + $0x70] ss:$8 sps:$4 sm:$0xff]   ;;  %v1329_v19 = vld [vmem:[%s1702_s1 + $0x80] ss:$8 sps:$4 sm:$0xff]  }
   0x7   :  { %530 = vmatpush1.bf16.msra.mxu0 %v1308_v3  ;;  %1288 = vmatpush1.bf16.msra.mxu1 %v1308_v3  ;;  %v1356_v15 = vld [vmem:[%s1703_s0 + $0x84] ss:$8 sps:$4 sm:$0xff]   ;;  %v1330_v20 = vld [vmem:[%s1702_s1 + $0x94] ss:$8 sps:$4 sm:$0xff]   ;;  %v1332_v21 = vld [vmem:[%s1702_s1 + $0x90] ss:$8 sps:$4 sm:$0xff]  }
   0x8   :  { %531 = vmatprep.subr.bf16.mxu0 %v1309_v4  ;;  %1273 = vmatprep.subr.bf16.mxu1 %v1309_v4  ;;  %v1327_v18 = vld [vmem:[%s1702_s1 + $0x84] ss:$8 sps:$4 sm:$0xff]   ;;  %v1335_v23 = vld [vmem:[%s1702_s1 + $0xa0] ss:$8 sps:$4 sm:$0xff]   ;;  %v1336_v24 = vld [vmem:[%s1702_s1 + $0xb4] ss:$8 sps:$4 sm:$0xff]  }
   0x9   :  { %559 = vmatprep.mubr.bf16.mxu0 %v1353_v13  ;;  %639 = vmatprep.mubr.bf16.mxu1 %v1356_v15  ;;  %v1333_v22 = vld [vmem:[%s1702_s1 + $0xa4] ss:$8 sps:$4 sm:$0xff]   ;;  %v1338_v25 = vld [vmem:[%s1702_s1 + $0xb0] ss:$8 sps:$4 sm:$0xff]   ;;  %v1341_v27 = vld [vmem:[%s1702_s1 + $0xc0] ss:$8 sps:$4 sm:$0xff]  }
   0xa   :  { %v1339_v26 = vld [vmem:[%s1702_s1 + $0xc4] ss:$8 sps:$4 sm:$0xff]   ;;  %v1342_v28 = vld [vmem:[%s1702_s1 + $0xd4] ss:$8 sps:$4 sm:$0xff]   ;;  %v1344_v29 = vld [vmem:[%s1702_s1 + $0xd0] ss:$8 sps:$4 sm:$0xff]  }
   0xb   :  { %532 = vmatpush1.bf16.msra.mxu0 %v1311_v5  ;;  %1289 = vmatpush1.bf16.msra.mxu1 %v1311_v5  ;;  %v1345_v30 = vld [vmem:[%s1702_s1 + $0xe4] ss:$8 sps:$4 sm:$0xff]   ;;  %v1347_v31 = vld [vmem:[%s1702_s1 + $0xe0] ss:$8 sps:$4 sm:$0xff]   ;;  %v1348_v32 = vld [vmem:[%s1702_s1 + $0xf4] ss:$8 sps:$4 sm:$0xff]  }
   0xc   :  { %533 = vmatprep.subr.bf16.mxu0 %v1312_v6  ;;  %1274 = vmatprep.subr.bf16.mxu1 %v1312_v6  ;;  %v1350_v33 = vld [vmem:[%s1702_s1 + $0xf0] ss:$8 sps:$4 sm:$0xff]   ;;  %v1351_v34 = vld [vmem:[%s1703_s0] ss:$8 sps:$4 sm:$0xff]   ;;  %v1357_v36 = vld [vmem:[%s1703_s0 + $0x14] ss:$8 sps:$4 sm:$0xff]  }
   0xd   :  { %v1354_v35 = vld [vmem:[%s1703_s0 + $0x80] ss:$8 sps:$4 sm:$0xff]   ;;  %v1359_v37 = vld [vmem:[%s1703_s0 + $0x94] ss:$8 sps:$4 sm:$0xff]   ;;  %v1361_v38 = vld [vmem:[%s1703_s0 + $0x10] ss:$8 sps:$4 sm:$0xff]  }
   0xe   :  { %v1362_v39 = vld [vmem:[%s1703_s0 + $0x90] ss:$8 sps:$4 sm:$0xff]   ;;  %v1363_v40 = vld [vmem:[%s1703_s0 + $0x24] ss:$8 sps:$4 sm:$0xff]   ;;  %v1367_v42 = vld [vmem:[%s1703_s0 + $0x20] ss:$8 sps:$4 sm:$0xff]  }
   0xf   :  { %534 = vmatpush1.bf16.msra.mxu0 %v1314_v7  ;;  %1290 = vmatpush1.bf16.msra.mxu1 %v1314_v7  ;;  %v1365_v41 = vld [vmem:[%s1703_s0 + $0xa4] ss:$8 sps:$4 sm:$0xff]   ;;  %v1368_v43 = vld [vmem:[%s1703_s0 + $0xa0] ss:$8 sps:$4 sm:$0xff]   ;;  %v1369_v44 = vld [vmem:[%s1703_s0 + $0x34] ss:$8 sps:$4 sm:$0xff]  }
  0x10   :  { %535 = vmatprep.subr.bf16.mxu0 %v1315_v8  ;;  %1275 = vmatprep.subr.bf16.mxu1 %v1315_v8  ;;  %v1371_v45 = vld [vmem:[%s1703_s0 + $0xb4] ss:$8 sps:$4 sm:$0xff]   ;;  %v1373_v46 = vld [vmem:[%s1703_s0 + $0x30] ss:$8 sps:$4 sm:$0xff]   ;;  %v1375_v48 = vld [vmem:[%s1703_s0 + $0x44] ss:$8 sps:$4 sm:$0xff]  }
  0x11   :  { %v1374_v47 = vld [vmem:[%s1703_s0 + $0xb0] ss:$8 sps:$4 sm:$0xff]   ;;  %v1377_v49 = vld [vmem:[%s1703_s0 + $0xc4] ss:$8 sps:$4 sm:$0xff]   ;;  %v1379_v50 = vld [vmem:[%s1703_s0 + $0x40] ss:$8 sps:$4 sm:$0xff]  }
  0x12   :  { %v1380_v51 = vld [vmem:[%s1703_s0 + $0xc0] ss:$8 sps:$4 sm:$0xff]   ;;  %v1381_v52 = vld [vmem:[%s1703_s0 + $0x54] ss:$8 sps:$4 sm:$0xff]   ;;  %v1385_v54 = vld [vmem:[%s1703_s0 + $0x50] ss:$8 sps:$4 sm:$0xff]  }
  0x13   :  { %536 = vmatpush1.bf16.msra.mxu0 %v1317_v9  ;;  %1291 = vmatpush1.bf16.msra.mxu1 %v1317_v9  ;;  %v1383_v53 = vld [vmem:[%s1703_s0 + $0xd4] ss:$8 sps:$4 sm:$0xff]   ;;  %v1386_v55 = vld [vmem:[%s1703_s0 + $0xd0] ss:$8 sps:$4 sm:$0xff]   ;;  %v1387_v56 = vld [vmem:[%s1703_s0 + $0x64] ss:$8 sps:$4 sm:$0xff]  }
  0x14   :  { %537 = vmatprep.subr.bf16.mxu0 %v1318_v10  ;;  %1276 = vmatprep.subr.bf16.mxu1 %v1318_v10  ;;  %v1389_v57 = vld [vmem:[%s1703_s0 + $0xe4] ss:$8 sps:$4 sm:$0xff]   ;;  %v1391_v58 = vld [vmem:[%s1703_s0 + $0x60] ss:$8 sps:$4 sm:$0xff]   ;;  %v1393_v60 = vld [vmem:[%s1703_s0 + $0x74] ss:$8 sps:$4 sm:$0xff]  }
  0x15   :  { %v1392_v59 = vld [vmem:[%s1703_s0 + $0xe0] ss:$8 sps:$4 sm:$0xff]   ;;  %v1395_v61 = vld [vmem:[%s1703_s0 + $0xf4] ss:$8 sps:$4 sm:$0xff]   ;;  %v1397_v62 = vld [vmem:[%s1703_s0 + $0x70] ss:$8 sps:$4 sm:$0xff]  }
  0x16   :  { %v1398_v63 = vld [vmem:[%s1703_s0 + $0xf0] ss:$8 sps:$4 sm:$0xff]  }
  0x17   :  { %538 = vmatpush1.bf16.msra.mxu0 %v1320_v11  ;;  %1292 = vmatpush1.bf16.msra.mxu1 %v1320_v11 }
  0x18   :  { %539 = vmatprep.subr.bf16.mxu0 %v1321_v12  ;;  %1277 = vmatprep.subr.bf16.mxu1 %v1321_v12 }
  0x1b   :  { %540 = vmatpush1.bf16.msra.mxu0 %v1323_v14  ;;  %1293 = vmatpush1.bf16.msra.mxu1 %v1323_v14 }
  0x1c   :  { %541 = vmatprep.subr.bf16.mxu0 %v1324_v16  ;;  %1278 = vmatprep.subr.bf16.mxu1 %v1324_v16 }
  0x1f   :  { %542 = vmatpush1.bf16.msra.mxu0 %v1326_v17  ;;  %1294 = vmatpush1.bf16.msra.mxu1 %v1326_v17 }
  0x20   :  { %543 = vmatprep.subr.bf16.mxu0 %v1327_v18  ;;  %1279 = vmatprep.subr.bf16.mxu1 %v1327_v18 }
  0x23   :  { %544 = vmatpush1.bf16.msra.mxu0 %v1329_v19  ;;  %1295 = vmatpush1.bf16.msra.mxu1 %v1329_v19 }
  0x24   :  { %545 = vmatprep.subr.bf16.mxu0 %v1330_v20  ;;  %1280 = vmatprep.subr.bf16.mxu1 %v1330_v20 }
  0x27   :  { %546 = vmatpush1.bf16.msra.mxu0 %v1332_v21  ;;  %1296 = vmatpush1.bf16.msra.mxu1 %v1332_v21 }
  0x28   :  { %547 = vmatprep.subr.bf16.mxu0 %v1333_v22  ;;  %1281 = vmatprep.subr.bf16.mxu1 %v1333_v22 }
  0x2b   :  { %548 = vmatpush1.bf16.msra.mxu0 %v1335_v23  ;;  %1297 = vmatpush1.bf16.msra.mxu1 %v1335_v23 }
  0x2c   :  { %549 = vmatprep.subr.bf16.mxu0 %v1336_v24  ;;  %1282 = vmatprep.subr.bf16.mxu1 %v1336_v24 }
  0x2f   :  { %550 = vmatpush1.bf16.msra.mxu0 %v1338_v25  ;;  %1298 = vmatpush1.bf16.msra.mxu1 %v1338_v25 }
  0x30   :  { %551 = vmatprep.subr.bf16.mxu0 %v1339_v26  ;;  %1283 = vmatprep.subr.bf16.mxu1 %v1339_v26 }
  0x33   :  { %552 = vmatpush1.bf16.msra.mxu0 %v1341_v27  ;;  %1299 = vmatpush1.bf16.msra.mxu1 %v1341_v27 }
  0x34   :  { %553 = vmatprep.subr.bf16.mxu0 %v1342_v28  ;;  %1284 = vmatprep.subr.bf16.mxu1 %v1342_v28 }
  0x37   :  { %554 = vmatpush1.bf16.msra.mxu0 %v1344_v29  ;;  %1300 = vmatpush1.bf16.msra.mxu1 %v1344_v29 }
  0x38   :  { %555 = vmatprep.subr.bf16.mxu0 %v1345_v30  ;;  %1285 = vmatprep.subr.bf16.mxu1 %v1345_v30 }
  0x3b   :  { %556 = vmatpush1.bf16.msra.mxu0 %v1347_v31  ;;  %1301 = vmatpush1.bf16.msra.mxu1 %v1347_v31 }
  0x3c   :  { %557 = vmatprep.subr.bf16.mxu0 %v1348_v32  ;;  %1286 = vmatprep.subr.bf16.mxu1 %v1348_v32 }
  0x3f   :  { %558 = vmatpush1.bf16.msra.mxu0 %v1350_v33  ;;  %1302 = vmatpush1.bf16.msra.mxu1 %v1350_v33 }
  0x42   :  { %560 = vmatmul.mubr.bf16.vlgmr.msra.gmra.mrb[0].mxu0 %v1351_v34  ;;  %640 = vmatmul.mubr.bf16.vlgmr.msra.gmra.mrb[0].mxu1 %v1354_v35 }
  0x43   :  { %569 = vmatprep.mubr.bf16.mxu0 %v1357_v36  ;;  %649 = vmatprep.mubr.bf16.mxu1 %v1359_v37 }
  0x4a   :  { %570 = vmatmul.mubr.bf16.gmra.mrb[4].mxu0 %v1361_v38  ;;  %650 = vmatmul.mubr.bf16.gmra.mrb[4].mxu1 %v1362_v39 }
  0x4b   :  { %579 = vmatprep.mubr.bf16.mxu0 %v1363_v40  ;;  %659 = vmatprep.mubr.bf16.mxu1 %v1365_v41 }
  0x52   :  { %580 = vmatmul.mubr.bf16.gmra.mrb[8].mxu0 %v1367_v42  ;;  %660 = vmatmul.mubr.bf16.gmra.mrb[8].mxu1 %v1368_v43 }
  0x53   :  { %589 = vmatprep.mubr.bf16.mxu0 %v1369_v44  ;;  %669 = vmatprep.mubr.bf16.mxu1 %v1371_v45 }
  0x5a   :  { %590 = vmatmul.mubr.bf16.gmra.mrb[12].mxu0 %v1373_v46  ;;  %670 = vmatmul.mubr.bf16.gmra.mrb[12].mxu1 %v1374_v47 }
  0x5b   :  { %599 = vmatprep.mubr.bf16.mxu0 %v1375_v48  ;;  %679 = vmatprep.mubr.bf16.mxu1 %v1377_v49 }
  0x62   :  { %600 = vmatmul.mubr.bf16.gmra.mrb[16].mxu0 %v1379_v50  ;;  %680 = vmatmul.mubr.bf16.gmra.mrb[16].mxu1 %v1380_v51 }
  0x63   :  { %609 = vmatprep.mubr.bf16.mxu0 %v1381_v52  ;;  %689 = vmatprep.mubr.bf16.mxu1 %v1383_v53 }
  0x6a   :  { %610 = vmatmul.mubr.bf16.gmra.mrb[20].mxu0 %v1385_v54  ;;  %690 = vmatmul.mubr.bf16.gmra.mrb[20].mxu1 %v1386_v55 }
  0x6b   :  { %619 = vmatprep.mubr.bf16.mxu0 %v1387_v56  ;;  %699 = vmatprep.mubr.bf16.mxu1 %v1389_v57 }
  0x72   :  { %620 = vmatmul.mubr.bf16.gmra.mrb[24].mxu0 %v1391_v58  ;;  %700 = vmatmul.mubr.bf16.gmra.mrb[24].mxu1 %v1392_v59 }
  0x73   :  { %629 = vmatprep.mubr.bf16.mxu0 %v1393_v60  ;;  %709 = vmatprep.mubr.bf16.mxu1 %v1395_v61 }
  0x7a   :  { %630 = vmatmul.mubr.bf16.gmra.mrb[28].mxu0 %v1397_v62  ;;  %710 = vmatmul.mubr.bf16.gmra.mrb[28].mxu1 %v1398_v63 }
 0x115   :  { %v561_v0 = vpop.f32.mrb[0].mxu0  ;;  %v641_v1 = vpop.f32.mrb[0].mxu1 }
 0x116   :  { %v563_v2 = vpop.f32.mrb[1].mxu0  ;;  %v643_v3 = vpop.f32.mrb[1].mxu1 }
 0x117   :  { %v1239_v4 = vpack.c.bf16 %v563_v2, %v561_v0  ;;  %v1255_v5 = vpack.c.bf16 %v643_v3, %v641_v1  ;;  %v565_v6 = vpop.f32.mrb[2].mxu0  ;;  %v645_v7 = vpop.f32.mrb[2].mxu1 }
 0x118   :  { %v567_v8 = vpop.f32.mrb[3].mxu0  ;;  %v647_v9 = vpop.f32.mrb[3].mxu1 }
 0x119   :  { %1107 = vst [vmem:[%s1704_s2] sm:$0xff] %v1239_v4  ;;  %1123 = vst [vmem:[%s1704_s2 + $0x80] sm:$0xff] %v1255_v5  ;;  %v1240_v10 = vpack.c.bf16 %v567_v8, %v565_v6  ;;  %v1256_v11 = vpack.c.bf16 %v647_v9, %v645_v7 }
 0x11b   :  { %1108 = vst [vmem:[%s1704_s2 + $0x8] sm:$0xff] %v1240_v10  ;;  %1124 = vst [vmem:[%s1704_s2 + $0x88] sm:$0xff] %v1256_v11 }
 0x11d   :  { %v571_v12 = vpop.f32.mrb[4].mxu0  ;;  %v651_v13 = vpop.f32.mrb[4].mxu1 }
 0x11e   :  { %v573_v14 = vpop.f32.mrb[5].mxu0  ;;  %v653_v15 = vpop.f32.mrb[5].mxu1 }
 0x11f   :  { %v1241_v16 = vpack.c.bf16 %v573_v14, %v571_v12  ;;  %v1257_v17 = vpack.c.bf16 %v653_v15, %v651_v13  ;;  %v575_v18 = vpop.f32.mrb[6].mxu0  ;;  %v655_v19 = vpop.f32.mrb[6].mxu1 }
 0x120   :  { %v577_v20 = vpop.f32.mrb[7].mxu0  ;;  %v657_v21 = vpop.f32.mrb[7].mxu1 }
 0x121   :  { %1109 = vst [vmem:[%s1704_s2 + $0x10] sm:$0xff] %v1241_v16  ;;  %1125 = vst [vmem:[%s1704_s2 + $0x90] sm:$0xff] %v1257_v17  ;;  %v1242_v22 = vpack.c.bf16 %v577_v20, %v575_v18  ;;  %v1258_v23 = vpack.c.bf16 %v657_v21, %v655_v19 }
 0x123   :  { %1110 = vst [vmem:[%s1704_s2 + $0x18] sm:$0xff] %v1242_v22  ;;  %1126 = vst [vmem:[%s1704_s2 + $0x98] sm:$0xff] %v1258_v23 }
 0x125   :  { %v581_v24 = vpop.f32.mrb[8].mxu0  ;;  %v661_v25 = vpop.f32.mrb[8].mxu1 }
 0x126   :  { %v583_v26 = vpop.f32.mrb[9].mxu0  ;;  %v663_v27 = vpop.f32.mrb[9].mxu1 }
 0x127   :  { %v1243_v28 = vpack.c.bf16 %v583_v26, %v581_v24  ;;  %v1259_v29 = vpack.c.bf16 %v663_v27, %v661_v25  ;;  %v585_v30 = vpop.f32.mrb[10].mxu0  ;;  %v665_v31 = vpop.f32.mrb[10].mxu1 }
 0x128   :  { %v587_v32 = vpop.f32.mrb[11].mxu0  ;;  %v667_v33 = vpop.f32.mrb[11].mxu1 }
 0x129   :  { %1111 = vst [vmem:[%s1704_s2 + $0x20] sm:$0xff] %v1243_v28  ;;  %1127 = vst [vmem:[%s1704_s2 + $0xa0] sm:$0xff] %v1259_v29  ;;  %v1244_v34 = vpack.c.bf16 %v587_v32, %v585_v30  ;;  %v1260_v35 = vpack.c.bf16 %v667_v33, %v665_v31 }
 0x12b   :  { %1112 = vst [vmem:[%s1704_s2 + $0x28] sm:$0xff] %v1244_v34  ;;  %1128 = vst [vmem:[%s1704_s2 + $0xa8] sm:$0xff] %v1260_v35 }
 0x12d   :  { %v591_v36 = vpop.f32.mrb[12].mxu0  ;;  %v671_v37 = vpop.f32.mrb[12].mxu1 }
 0x12e   :  { %v593_v38 = vpop.f32.mrb[13].mxu0  ;;  %v673_v39 = vpop.f32.mrb[13].mxu1 }
 0x12f   :  { %v1245_v40 = vpack.c.bf16 %v593_v38, %v591_v36  ;;  %v1261_v41 = vpack.c.bf16 %v673_v39, %v671_v37  ;;  %v595_v42 = vpop.f32.mrb[14].mxu0  ;;  %v675_v43 = vpop.f32.mrb[14].mxu1 }
 0x130   :  { %v597_v44 = vpop.f32.mrb[15].mxu0  ;;  %v677_v45 = vpop.f32.mrb[15].mxu1 }
 0x131   :  { %1113 = vst [vmem:[%s1704_s2 + $0x30] sm:$0xff] %v1245_v40  ;;  %1129 = vst [vmem:[%s1704_s2 + $0xb0] sm:$0xff] %v1261_v41  ;;  %v1246_v46 = vpack.c.bf16 %v597_v44, %v595_v42  ;;  %v1262_v47 = vpack.c.bf16 %v677_v45, %v675_v43 }
 0x133   :  { %1114 = vst [vmem:[%s1704_s2 + $0x38] sm:$0xff] %v1246_v46  ;;  %1130 = vst [vmem:[%s1704_s2 + $0xb8] sm:$0xff] %v1262_v47 }
 0x135   :  { %v601_v48 = vpop.f32.mrb[16].mxu0  ;;  %v681_v49 = vpop.f32.mrb[16].mxu1 }
 0x136   :  { %v603_v50 = vpop.f32.mrb[17].mxu0  ;;  %v683_v51 = vpop.f32.mrb[17].mxu1 }
 0x137   :  { %v1247_v52 = vpack.c.bf16 %v603_v50, %v601_v48  ;;  %v1263_v53 = vpack.c.bf16 %v683_v51, %v681_v49  ;;  %v605_v54 = vpop.f32.mrb[18].mxu0  ;;  %v685_v55 = vpop.f32.mrb[18].mxu1 }
 0x138   :  { %v607_v56 = vpop.f32.mrb[19].mxu0  ;;  %v687_v57 = vpop.f32.mrb[19].mxu1 }
 0x139   :  { %1115 = vst [vmem:[%s1704_s2 + $0x40] sm:$0xff] %v1247_v52  ;;  %1131 = vst [vmem:[%s1704_s2 + $0xc0] sm:$0xff] %v1263_v53  ;;  %v1248_v58 = vpack.c.bf16 %v607_v56, %v605_v54  ;;  %v1264_v59 = vpack.c.bf16 %v687_v57, %v685_v55 }
 0x13b   :  { %1116 = vst [vmem:[%s1704_s2 + $0x48] sm:$0xff] %v1248_v58  ;;  %1132 = vst [vmem:[%s1704_s2 + $0xc8] sm:$0xff] %v1264_v59 }
 0x13d   :  { %v611_v60 = vpop.f32.mrb[20].mxu0  ;;  %v691_v61 = vpop.f32.mrb[20].mxu1 }
 0x13e   :  { %v613_v62 = vpop.f32.mrb[21].mxu0  ;;  %v693_v63 = vpop.f32.mrb[21].mxu1 }
 0x13f   :  { %v1249_v0 = vpack.c.bf16 %v613_v62, %v611_v60  ;;  %v1265_v1 = vpack.c.bf16 %v693_v63, %v691_v61  ;;  %v615_v2 = vpop.f32.mrb[22].mxu0  ;;  %v695_v3 = vpop.f32.mrb[22].mxu1 }
 0x140   :  { %v617_v4 = vpop.f32.mrb[23].mxu0  ;;  %v697_v5 = vpop.f32.mrb[23].mxu1 }
 0x141   :  { %1117 = vst [vmem:[%s1704_s2 + $0x50] sm:$0xff] %v1249_v0  ;;  %1133 = vst [vmem:[%s1704_s2 + $0xd0] sm:$0xff] %v1265_v1  ;;  %v1250_v6 = vpack.c.bf16 %v617_v4, %v615_v2  ;;  %v1266_v7 = vpack.c.bf16 %v697_v5, %v695_v3 }
 0x143   :  { %1118 = vst [vmem:[%s1704_s2 + $0x58] sm:$0xff] %v1250_v6  ;;  %1134 = vst [vmem:[%s1704_s2 + $0xd8] sm:$0xff] %v1266_v7 }
 0x145   :  { %v621_v8 = vpop.f32.mrb[24].mxu0  ;;  %v701_v9 = vpop.f32.mrb[24].mxu1 }
 0x146   :  { %v623_v10 = vpop.f32.mrb[25].mxu0  ;;  %v703_v11 = vpop.f32.mrb[25].mxu1 }
 0x147   :  { %v1251_v12 = vpack.c.bf16 %v623_v10, %v621_v8  ;;  %v1267_v13 = vpack.c.bf16 %v703_v11, %v701_v9  ;;  %v625_v14 = vpop.f32.mrb[26].mxu0  ;;  %v705_v15 = vpop.f32.mrb[26].mxu1 }
 0x148   :  { %v627_v16 = vpop.f32.mrb[27].mxu0  ;;  %v707_v17 = vpop.f32.mrb[27].mxu1 }
 0x149   :  { %1119 = vst [vmem:[%s1704_s2 + $0x60] sm:$0xff] %v1251_v12  ;;  %1135 = vst [vmem:[%s1704_s2 + $0xe0] sm:$0xff] %v1267_v13  ;;  %v1252_v18 = vpack.c.bf16 %v627_v16, %v625_v14  ;;  %v1268_v19 = vpack.c.bf16 %v707_v17, %v705_v15 }
 0x14b   :  { %1120 = vst [vmem:[%s1704_s2 + $0x68] sm:$0xff] %v1252_v18  ;;  %1136 = vst [vmem:[%s1704_s2 + $0xe8] sm:$0xff] %v1268_v19 }
 0x14d   :  { %v631_v20 = vpop.f32.mrb[28].mxu0  ;;  %v711_v21 = vpop.f32.mrb[28].mxu1 }
 0x14e   :  { %v633_v22 = vpop.f32.mrb[29].mxu0  ;;  %v713_v23 = vpop.f32.mrb[29].mxu1 }
 0x14f   :  { %v1253_v24 = vpack.c.bf16 %v633_v22, %v631_v20  ;;  %v1269_v25 = vpack.c.bf16 %v713_v23, %v711_v21  ;;  %v635_v26 = vpop.f32.mrb[30].mxu0  ;;  %v715_v27 = vpop.f32.mrb[30].mxu1 }
 0x150   :  { %v637_v28 = vpop.f32.mrb[31].mxu0  ;;  %v717_v29 = vpop.f32.mrb[31].mxu1 }
 0x151   :  { %1121 = vst [vmem:[%s1704_s2 + $0x70] sm:$0xff] %v1253_v24  ;;  %1137 = vst [vmem:[%s1704_s2 + $0xf0] sm:$0xff] %v1269_v25  ;;  %v1254_v30 = vpack.c.bf16 %v637_v28, %v635_v26  ;;  %v1270_v31 = vpack.c.bf16 %v717_v29, %v715_v27 }
 0x153   :  { %1122 = vst [vmem:[%s1704_s2 + $0x78] sm:$0xff] %v1254_v30  ;;  %1138 = vst [vmem:[%s1704_s2 + $0xf8] sm:$0xff] %v1270_v31 }

</bundles_post_ra>
